<compile_context>
chip_gen: v5e
topology: v5e:2x2
jax: 0.10.0
libtpu: 0.0.40
codegen_flags: <defaults>
</compile_context>

<pallas_src>
import functools
import math

import jax
import jax.numpy as jnp
from jax import lax
from jax.experimental import pallas as pl
from jax.experimental.pallas import tpu as pltpu


def _splitmix32(x):
    """uint32 -> uint32 mixing function (wrapping arithmetic)."""
    x = (x ^ (x >> 16)) * jnp.uint32(0x7FEB352D)
    x = (x ^ (x >> 15)) * jnp.uint32(0x846CA68B)
    x = x ^ (x >> 16)
    return x


def _pe_dropout_kernel(x_ref, pe_ref, o_ref, *, p: float, seed: int):
    """One (TS, B, E) tile: add positional table (broadcast over batch) + dropout."""
    ts, b, e = x_ref.shape

    if p >= 1.0:
        o_ref[...] = jnp.zeros(o_ref.shape, o_ref.dtype)
        return

    y = x_ref[...].astype(jnp.float32) + pe_ref[...].astype(jnp.float32)

    if p > 0.0:
        # Global element index for this tile (unique across the whole tensor),
        # so every tile draws independent random bits.
        shape = (ts, b, e)
        row = lax.broadcasted_iota(jnp.int32, shape, 0) + pl.program_id(0) * ts
        bi = lax.broadcasted_iota(jnp.int32, shape, 1)
        ei = lax.broadcasted_iota(jnp.int32, shape, 2)
        idx = (row * b + bi) * e + ei                      # non-negative int32
        u = idx.astype(jnp.uint32) ^ (
            jnp.uint32(seed & 0xFFFFFFFF) * jnp.uint32(0x9E3779B9))
        bits = _splitmix32(u)
        # Inverted dropout: keep with prob (1-p), scale kept by 1/(1-p).
        # Pure integer threshold compare (no float-uniform conversion).
        threshold = jnp.uint32(min(int(round(p * 4294967296.0)), 0xFFFFFFFF))
        keep = bits >= threshold
        y = jnp.where(keep, y * jnp.float32(1.0 / (1.0 - p)), jnp.float32(0.0))

    o_ref[...] = y.astype(o_ref.dtype)


def make_pos_embedding(emb_size: int, maxlen: int = 5000) -> jnp.ndarray:
    """Same construction as the PyTorch __init__ (sin on even, cos on odd cols)."""
    den = jnp.exp(-jnp.arange(0, emb_size, 2, dtype=jnp.float32)
                  * (math.log(10000.0) / emb_size))
    pos = jnp.arange(0, maxlen, dtype=jnp.float32).reshape(maxlen, 1)
    pe = jnp.zeros((maxlen, emb_size), dtype=jnp.float32)
    pe = pe.at[:, 0::2].set(jnp.sin(pos * den))
    pe = pe.at[:, 1::2].set(jnp.cos(pos * den))
    return pe[:, None, :]                                  # (maxlen, 1, emb)


def positional_encoding_forward(token_embedding: jnp.ndarray,
                                pos_embedding: jnp.ndarray,
                                *,
                                dropout_p: float,
                                seed: int = 0,
                                tile_s: int | None = None) -> jnp.ndarray:
    S, B, E = token_embedding.shape
    dtype = token_embedding.dtype
    pe = pos_embedding[:S].astype(dtype)                   # (S, 1, E), match dtype

    itemsize = jnp.dtype(dtype).itemsize
    if tile_s is None:
        # Target ~4 MiB per activation tile: 2x(in) + 2x(out) + 2x(pe) stays
        # well under v7x's 64 MiB VMEM and comfortably inside the 32 MiB
        # scoped limit we request below (also safe on v5e/v6e).
        target_bytes = 4 * 1024 * 1024
        rows = max(1, target_bytes // max(1, B * E * itemsize))
        tile_s = min(S, rows)
        if tile_s >= 8:
            tile_s -= tile_s % 8                           # sublane-friendly
    tile_s = max(1, min(int(tile_s), S))

    grid = (pl.cdiv(S, tile_s),)
    kernel = functools.partial(_pe_dropout_kernel,
                               p=float(dropout_p), seed=int(seed))

    return pl.pallas_call(
        kernel,
        out_shape=jax.ShapeDtypeStruct((S, B, E), dtype),
        grid=grid,
        in_specs=[
            pl.BlockSpec((tile_s, B, E), lambda i: (i, 0, 0)),
            pl.BlockSpec((tile_s, 1, E), lambda i: (i, 0, 0)),
        ],
        out_specs=pl.BlockSpec((tile_s, B, E), lambda i: (i, 0, 0)),
        compiler_params=pltpu.CompilerParams(
            dimension_semantics=("parallel",),             # megacore-shard S tiles
            vmem_limit_bytes=32 * 1024 * 1024,
        ),
    )(token_embedding, pe)


if __name__ == "__main__":
    # Small but lane-dense shapes: E = 128 keeps stores unmasked on TPU.
    SEQ, BATCH, EMB = 8, 2, 128
    MAXLEN = 64

    key = jax.random.PRNGKey(0)
    x = jax.random.normal(key, (SEQ, BATCH, EMB), dtype=jnp.float32)

    pos_embedding = make_pos_embedding(EMB, MAXLEN)
    ref = x + pos_embedding[:SEQ]

    # 1) p = 0.0 -> dropout is identity; exact match with reference.
    out0 = positional_encoding_forward(x, pos_embedding, dropout_p=0.0)
    out0 = jax.block_until_ready(out0)
    assert out0.shape == (SEQ, BATCH, EMB)
    assert jnp.allclose(out0, ref, atol=1e-6), "mismatch vs. reference add"

    # 2) p = 0.1 -> inverted dropout: elements are either 0 or ref / (1 - p).
    # TODO(synk): mask will never bit-match PyTorch's RNG stream (statistical
    # equivalence only).
    p = 0.1
    out1 = positional_encoding_forward(x, pos_embedding, dropout_p=p, seed=123)
    out1 = jax.block_until_ready(out1)
    assert out1.shape == (SEQ, BATCH, EMB)
    scaled = ref / (1.0 - p)
    ok = jnp.where(out1 == 0.0, True,
                   jnp.isclose(out1, scaled, atol=1e-5, rtol=1e-5))
    assert bool(jnp.all(ok)), "kept elements not scaled by 1/(1-p)"
    drop_frac = float(jnp.mean((out1 == 0.0).astype(jnp.float32)))
    assert 0.01 < drop_frac < 0.30, f"drop fraction {drop_frac} far from p={p}"

    print("KERNEL_OK")
</pallas_src>

<mosaic_0001>
module attributes {stable_mosaic.version = 11 : i64} {
  func.func @_pe_dropout_kernel(%arg0: i32, %arg1: memref<8x2x128xf32, #tpu.memory_space<vmem>>, %arg2: memref<8x1x128xf32, #tpu.memory_space<vmem>>, %arg3: memref<8x2x128xf32, #tpu.memory_space<vmem>>) attributes {dimension_semantics = [#tpu.dimension_semantics<parallel>], iteration_bounds = array<i64: 1>, scalar_prefetch = 0 : i64, scratch_operands = 0 : i64, tpu.core_type = #tpu.core_type<tc>, window_params = [{transform_indices = @transform_0, window_bounds = array<i64: 8, 2, 128>}, {transform_indices = @transform_1, window_bounds = array<i64: 8, 1, 128>}, {transform_indices = @transform_2, window_bounds = array<i64: 8, 2, 128>}]} {
    %c0 = arith.constant 0 : index
    %c0_0 = arith.constant 0 : index
    %c0_1 = arith.constant 0 : index
    %0 = vector.load %arg1[%c0, %c0_0, %c0_1] : memref<8x2x128xf32, #tpu.memory_space<vmem>>, vector<8x2x128xf32>
    %c0_2 = arith.constant 0 : index
    %c0_3 = arith.constant 0 : index
    %c0_4 = arith.constant 0 : index
    %1 = vector.load %arg2[%c0_2, %c0_3, %c0_4] : memref<8x1x128xf32, #tpu.memory_space<vmem>>, vector<8x1x128xf32>
    %2 = vector.broadcast %1 : vector<8x1x128xf32> to vector<8x2x128xf32>
    %3 = arith.addf %0, %2 : vector<8x2x128xf32>
    %c0_5 = arith.constant 0 : index
    %c0_6 = arith.constant 0 : index
    %c0_7 = arith.constant 0 : index
    %4 = vector.load %arg3[%c0_5, %c0_6, %c0_7] : memref<8x2x128xf32, #tpu.memory_space<vmem>>, vector<8x2x128xf32>
    tpu.vector_store %arg3[%c0_5, %c0_6, %c0_7], %3 {strides = array<i32>} : memref<8x2x128xf32, #tpu.memory_space<vmem>>, vector<8x2x128xf32>,
    return
  }
  func.func @transform_0(%arg0: i32) -> (i32, i32, i32) {
    %c0_i32 = arith.constant 0 : i32
    %c0_i32_0 = arith.constant 0 : i32
    %c0_i32_1 = arith.constant 0 : i32
    return %arg0, %c0_i32, %c0_i32_0 : i32, i32, i32
  }
  func.func @transform_1(%arg0: i32) -> (i32, i32, i32) {
    %c0_i32 = arith.constant 0 : i32
    %c0_i32_0 = arith.constant 0 : i32
    %c0_i32_1 = arith.constant 0 : i32
    return %arg0, %c0_i32, %c0_i32_0 : i32, i32, i32
  }
  func.func @transform_2(%arg0: i32) -> (i32, i32, i32) {
    %c0_i32 = arith.constant 0 : i32
    %c0_i32_0 = arith.constant 0 : i32
    %c0_i32_1 = arith.constant 0 : i32
    return %arg0, %c0_i32, %c0_i32_0 : i32, i32, i32
  }
}

</mosaic_0001>

<bundles_post_ra>
// kernel: tpu_custom_call.1
= control target key start
LH: loop header
LB: loop body
LE: loop exit
PB: predicated region body
PF: predicated region fallthrough
CT: control target
= control target key end

     0   :  { %7 = vsyncpa [#allocation3], 0  ;;  %s257_s0 = inlined_call_operand.hbm [shape: f32[8,2,128], index: 0, kind: input, shape index: {}]   ;;  %s258_s1 = inlined_call_operand.hbm [shape: f32[8,1,128], index: 1, kind: input, shape index: {}]   ;;  %s259_s2 = inlined_call_operand.hbm [shape: f32[8,2,128], index: 2, kind: output, shape index: {}]  }
   0x1   :  { %8 = vsyncpa [#allocation6], 0 }
   0x2   :  { %9 = vsyncpa [#allocation4], 0  ;;  %s14_s11 = sshll.u32 %s257_s0, 4  ;;  %s213_s12 = smov [#allocation2]   ;;  %s15_s11 = int_to_ptr.hbm [resolvable:$true] %s14_s11 }
   0x3   :  { %s16_s13 = sshll.u32 %s213_s12, 4  ;;  %s27_s16 = sshll.u32 %s258_s1, 4  ;;  %s17_s13 = int_to_ptr.vmem [resolvable:$true] %s16_s13  ;;  %s28_s16 = int_to_ptr.hbm [resolvable:$true] %s27_s16 }
   0x4   :  { %s214_s17 = smov 32   ;;  %s215_s18 = smov 2  }
   0x5   :  { %22 = dma.hbm_to_vmem [thread:$0]  %s15_s11, 256, %s17_s13, [#allocation3], %s214_s17, %s214_s17, %s215_s18  }
   0x6   :  { %s216_s19 = smov [#allocation5]   ;;  %s217_s21 = smov 16  }
   0x7   :  { %s29_s20 = sshll.u32 %s216_s19, 4  ;;  %s218_s0 = smov 1   ;;  %s30_s20 = int_to_ptr.vmem [resolvable:$true] %s29_s20 }
   0x8   :  { %35 = dma.hbm_to_vmem [thread:$0]  %s28_s16, 128, %s30_s20, [#allocation6], %s217_s21, %s217_s21, %s218_s0  }
   0x9   :  { %207 = dma.done.wait [#allocation3], 256  }
   0xa   :  { %208 = vsyncadd [#allocation3], 4294967040 }
   0xb   :  { %209 = dma.done.wait [#allocation6], 128  }
   0xc   :  { %210 = vsyncadd [#allocation6], 4294967168  ;;  %s219_s22 = smov [#allocation7]   ;;  %s106_s25 = sshll.u32 %s259_s2, 4  ;;  %v44_v0 = vld [vmem:[#allocation2] sm:$0x3]  ;;  %s107_s25 = int_to_ptr.hbm [resolvable:$true] %s106_s25 }
   0xd   :  { %s244_s23 = sshll.u32 %s219_s22, 4  ;;  %v127_v1 = vld [vmem:[#allocation5] ss:$0 sm:$0xff]  ;;  %v45_v2 = vld [vmem:[#allocation2 + $0x2] sm:$0x3]  ;;  %s105_s23 = int_to_ptr.vmem [resolvable:$true] %s244_s23 }
   0xe   :  { %v128_v3 = vld [vmem:[#allocation5 + $0x1] ss:$0 sm:$0xff]  ;;  %v84_v4 = vadd.f32 %v127_v1, %v44_v0  ;;  %v46_v5 = vld [vmem:[#allocation2 + $0x4] sm:$0x3]  ;;  %v129_v6 = vld [vmem:[#allocation5 + $0x2] ss:$0 sm:$0xff] }
   0xf   :  { %v85_v7 = vadd.f32 %v128_v3, %v45_v2  ;;  %v47_v8 = vld [vmem:[#allocation2 + $0x6] sm:$0x3]  ;;  %v130_v9 = vld [vmem:[#allocation5 + $0x3] ss:$0 sm:$0xff]  ;;  %v86_v10 = vadd.f32 %v129_v6, %v46_v5  ;;  %v48_v11 = vld [vmem:[#allocation2 + $0x8] sm:$0x3] }
  0x10   :  { %92 = vst [vmem:[#allocation7] sm:$0x3] %v84_v4  ;;  %v87_v12 = vadd.f32 %v130_v9, %v47_v8  ;;  %v131_v13 = vld [vmem:[#allocation5 + $0x4] ss:$0 sm:$0xff]  ;;  %v49_v14 = vld [vmem:[#allocation2 + $0xa] sm:$0x3] }
  0x11   :  { %93 = vst [vmem:[#allocation7 + $0x2] sm:$0x3] %v85_v7  ;;  %v132_v15 = vld [vmem:[#allocation5 + $0x5] ss:$0 sm:$0xff]  ;;  %v88_v16 = vadd.f32 %v131_v13, %v48_v11  ;;  %v50_v17 = vld [vmem:[#allocation2 + $0xc] sm:$0x3] }
  0x12   :  { %94 = vst [vmem:[#allocation7 + $0x4] sm:$0x3] %v86_v10  ;;  %v89_v18 = vadd.f32 %v132_v15, %v49_v14  ;;  %v133_v19 = vld [vmem:[#allocation5 + $0x6] ss:$0 sm:$0xff]  ;;  %v51_v20 = vld [vmem:[#allocation2 + $0xe] sm:$0x3] }
  0x13   :  { %95 = vst [vmem:[#allocation7 + $0x6] sm:$0x3] %v87_v12  ;;  %v134_v21 = vld [vmem:[#allocation5 + $0x7] ss:$0 sm:$0xff]  ;;  %v90_v22 = vadd.f32 %v133_v19, %v50_v17 }
  0x14   :  { %96 = vst [vmem:[#allocation7 + $0x8] sm:$0x3] %v88_v16  ;;  %v91_v23 = vadd.f32 %v134_v21, %v51_v20 }
  0x15   :  { %97 = vst [vmem:[#allocation7 + $0xa] sm:$0x3] %v89_v18 }
  0x16   :  { %98 = vst [vmem:[#allocation7 + $0xc] sm:$0x3] %v90_v22 }
  0x17   :  { %99 = vst [vmem:[#allocation7 + $0xe] sm:$0x3] %v91_v23 }
  0x18   :  { %112 = dma.vmem_to_hbm [thread:$0]  %s105_s23, 256, %s107_s25, [#allocation4], %s214_s17, %s214_s17, %s215_s18  }
  0x19   :  { %211 = dma.done.wait [#allocation4], 256  }
  0x1a   :  { %212 = vsyncadd [#allocation4], 4294967040 }
  0x1b   :  { %117 = vsyncpa [#allocation3], 1 }
  0x1c   :  { %118 = vsyncpa [#allocation6], 1 }
  0x1d   :  { %119 = vsyncpa [#allocation4], 1 }

</bundles_post_ra>
